<compile_context>
chip_gen: v6e
topology: v6e:2x2x1
jax: 0.10.0
libtpu: 0.0.40
codegen_flags: <defaults>
</compile_context>

<pallas_src>
import jax
import jax.numpy as jnp
from jax.experimental import pallas as pl
from jax.experimental.pallas import tpu as pltpu

LANE = 128            # hidden feature dims pad to the 128-lane vreg width
IN_ALIGN = 16         # input feature pad (bf16 sublane-pair friendly, == block dim)
OUT_ALIGN = 8         # output feature pad (f32 sublane tile)
MAX_BATCH_TILE = 1024  # batch tile for large batches (512-2048 sweet spot)


def _round_up(n, m):
    return ((n + m - 1) // m) * m


def _sigmoid_approx(x):
    # exp -> EUP, approximate reciprocal -> EUP; VALU only does the add/neg.
    return pl.reciprocal(1.0 + jnp.exp(-x), approx=True)


def _sigmoid_exact(x):
    # Exact sigmoid for the final (tiny, 8-lane) output layer.
    return 1.0 / (1.0 + jnp.exp(-x))


def mlp_kernel(x_ref, w1_ref, b1_ref, w2_ref, b2_ref, w3_ref, b3_ref, o_ref):
    # x tile: (TILE_B, 16) bf16; w1: (16,128), w2: (128,128), w3: (128,8) bf16;
    # biases f32.  All weights/biases are VMEM-resident across grid steps.
    h1 = _sigmoid_approx(
        jnp.dot(x_ref[...], w1_ref[...], preferred_element_type=jnp.float32)
        + b1_ref[...])
    h2 = _sigmoid_approx(
        jnp.dot(h1.astype(jnp.bfloat16), w2_ref[...],
                preferred_element_type=jnp.float32)
        + b2_ref[...])
    z3 = (jnp.dot(h2.astype(jnp.bfloat16), w3_ref[...],
                  preferred_element_type=jnp.float32)
          + b3_ref[...])
    o_ref[...] = _sigmoid_exact(z3).astype(o_ref.dtype)


def pad_and_cast_params(params):
    """Zero-pad each layer to its minimal aligned shape; weights -> bf16.

    w1: (n_in->16, h1->128), w2: (h1->128, h2->128), w3: (h2->128, n_out->8).
    Zero padding keeps the math exact; biases stay f32.
    """
    def pad_w(w, row_pad, col_pad):
        fi, fo = w.shape
        wp = jnp.zeros((row_pad, col_pad), jnp.float32)
        return wp.at[:fi, :fo].set(w).astype(jnp.bfloat16)

    def pad_b(b, col_pad):
        fo = b.shape[-1]
        bp = jnp.zeros((1, col_pad), jnp.float32)
        return bp.at[:, :fo].set(b.reshape(1, fo))

    n_in, n_h1 = params["w1"].shape
    n_h2 = params["w2"].shape[1]
    n_out = params["w3"].shape[1]

    in_pad = _round_up(n_in, IN_ALIGN)
    h1_pad = _round_up(n_h1, LANE)
    h2_pad = _round_up(n_h2, LANE)
    out_pad = _round_up(n_out, OUT_ALIGN)

    padded = {
        "w1": pad_w(params["w1"], in_pad, h1_pad), "b1": pad_b(params["b1"], h1_pad),
        "w2": pad_w(params["w2"], h1_pad, h2_pad), "b2": pad_b(params["b2"], h2_pad),
        "w3": pad_w(params["w3"], h2_pad, out_pad), "b3": pad_b(params["b3"], out_pad),
    }
    return padded, n_out


def network_forward(x, padded_params, n_out):
    """x: (batch, n_in) float32.  padded_params: output of pad_and_cast_params."""
    w1, b1 = padded_params["w1"], padded_params["b1"]
    w2, b2 = padded_params["w2"], padded_params["b2"]
    w3, b3 = padded_params["w3"], padded_params["b3"]

    batch, n_in = x.shape
    in_pad = w1.shape[0]
    h1_pad = w1.shape[1]
    h2_pad = w2.shape[1]
    out_pad = w3.shape[1]

    # Batch tile: big tiles for large batches; for moderate batches pick a
    # tile giving >=2 grid steps (v7x dual-TC), rounded to 16 (bf16 sublanes).
    if batch >= MAX_BATCH_TILE:
        tile_b = MAX_BATCH_TILE
    else:
        tile_b = min(MAX_BATCH_TILE, _round_up((batch + 1) // 2, 16))
    batch_pad = _round_up(batch, tile_b)

    # Build the padded input directly in bf16 (no f32 intermediate pass).
    xb = x.astype(jnp.bfloat16)
    xp = jnp.zeros((batch_pad, in_pad), jnp.bfloat16).at[:batch, :n_in].set(xb)

    grid = (batch_pad // tile_b,)

    out = pl.pallas_call(
        mlp_kernel,
        out_shape=jax.ShapeDtypeStruct((batch_pad, out_pad), jnp.float32),
        grid=grid,
        in_specs=[
            pl.BlockSpec((tile_b, in_pad), lambda i: (i, 0)),   # x tile, pipelined
            pl.BlockSpec((in_pad, h1_pad), lambda i: (0, 0)),   # w1 (resident)
            pl.BlockSpec((1, h1_pad), lambda i: (0, 0)),        # b1
            pl.BlockSpec((h1_pad, h2_pad), lambda i: (0, 0)),   # w2
            pl.BlockSpec((1, h2_pad), lambda i: (0, 0)),        # b2
            pl.BlockSpec((h2_pad, out_pad), lambda i: (0, 0)),  # w3
            pl.BlockSpec((1, out_pad), lambda i: (0, 0)),       # b3
        ],
        out_specs=pl.BlockSpec((tile_b, out_pad), lambda i: (i, 0)),
        compiler_params=pltpu.CompilerParams(
            dimension_semantics=("parallel",),
        ),
    )(xp, w1, b1, w2, b2, w3, b3)

    # Slice off padding: real batch rows, real output columns.
    return out[:batch, :n_out]


def init_params(key, max_num_enemies):
    """Deterministic init mimicking torch.nn.Linear default (uniform +/- 1/sqrt(fan_in))."""
    n_in = max_num_enemies * 2 + 1
    n_h1 = 10 * n_in
    n_h2 = 5 * n_in
    n_out = 2

    def linear(key, fan_in, fan_out):
        kw, kb = jax.random.split(key)
        bound = 1.0 / jnp.sqrt(fan_in)
        # stored as (in, out) == torch weight (out, in) transposed
        w = jax.random.uniform(kw, (fan_in, fan_out), jnp.float32, -bound, bound)
        b = jax.random.uniform(kb, (1, fan_out), jnp.float32, -bound, bound)
        return w, b

    k1, k2, k3 = jax.random.split(key, 3)
    w1, b1 = linear(k1, n_in, n_h1)
    w2, b2 = linear(k2, n_h1, n_h2)
    w3, b3 = linear(k3, n_h2, n_out)
    return ({"w1": w1, "b1": b1, "w2": w2, "b2": b2, "w3": w3, "b3": b3},
            (n_in, n_h1, n_h2, n_out))


def reference_forward(x, params, cast_bf16=False):
    """Pure-JAX reference.  With cast_bf16=True it mirrors the kernel's MXU dtypes."""
    def prep(a):
        return a.astype(jnp.bfloat16).astype(jnp.float32) if cast_bf16 else a
    h = jax.nn.sigmoid(jnp.dot(prep(x), prep(params["w1"]),
                               preferred_element_type=jnp.float32) + params["b1"])
    h = jax.nn.sigmoid(jnp.dot(prep(h), prep(params["w2"]),
                               preferred_element_type=jnp.float32) + params["b2"])
    return jax.nn.sigmoid(jnp.dot(prep(h), prep(params["w3"]),
                                  preferred_element_type=jnp.float32) + params["b3"])


if __name__ == "__main__":
    max_num_enemies = 4   # -> n_inputs = 9, hidden_1 = 90, hidden_2 = 45, outputs = 2
    batch = 8

    key = jax.random.PRNGKey(0)
    kp, kx = jax.random.split(key)
    params, (n_in, n_h1, n_h2, n_out) = init_params(kp, max_num_enemies)
    padded_params, n_out_real = pad_and_cast_params(params)

    x = jax.random.normal(kx, (batch, n_in), jnp.float32)

    out = network_forward(x, padded_params, n_out_real)
    out = jax.block_until_ready(out)

    assert out.shape == (batch, n_out), out.shape

    # Tight check vs. a reference using the same bf16 operand rounding.
    ref_bf16 = reference_forward(x, params, cast_bf16=True)
    assert jnp.allclose(out, ref_bf16, atol=5e-3, rtol=5e-3), \
        "mismatch vs bf16-rounded reference"

    # Loose check vs. the full-f32 original-module semantics.
    ref_f32 = reference_forward(x, params, cast_bf16=False)
    assert jnp.allclose(out, ref_f32, atol=5e-2, rtol=5e-2), \
        "mismatch vs f32 reference"

    print("KERNEL_OK")
</pallas_src>

<mosaic_0001>
module attributes {stable_mosaic.version = 11 : i64} {
  func.func @mlp_kernel(%arg0: i32, %arg1: memref<16x16xbf16, #tpu.memory_space<vmem>>, %arg2: memref<16x128xbf16, #tpu.memory_space<vmem>>, %arg3: memref<1x128xf32, #tpu.memory_space<vmem>>, %arg4: memref<128x128xbf16, #tpu.memory_space<vmem>>, %arg5: memref<1x128xf32, #tpu.memory_space<vmem>>, %arg6: memref<128x8xbf16, #tpu.memory_space<vmem>>, %arg7: memref<1x8xf32, #tpu.memory_space<vmem>>, %arg8: memref<16x8xf32, #tpu.memory_space<vmem>>) attributes {dimension_semantics = [#tpu.dimension_semantics<parallel>], iteration_bounds = array<i64: 1>, scalar_prefetch = 0 : i64, scratch_operands = 0 : i64, tpu.core_type = #tpu.core_type<tc>, window_params = [{transform_indices = @transform_0, window_bounds = array<i64: 16, 16>}, {pipeline_mode = #tpu.pipeline_mode<synchronous>, transform_indices = @transform_1, window_bounds = array<i64: 16, 128>}, {pipeline_mode = #tpu.pipeline_mode<synchronous>, transform_indices = @transform_2, window_bounds = array<i64: 1, 128>}, {pipeline_mode = #tpu.pipeline_mode<synchronous>, transform_indices = @transform_3, window_bounds = array<i64: 128, 128>}, {pipeline_mode = #tpu.pipeline_mode<synchronous>, transform_indices = @transform_4, window_bounds = array<i64: 1, 128>}, {pipeline_mode = #tpu.pipeline_mode<synchronous>, transform_indices = @transform_5, window_bounds = array<i64: 128, 8>}, {pipeline_mode = #tpu.pipeline_mode<synchronous>, transform_indices = @transform_6, window_bounds = array<i64: 1, 8>}, {transform_indices = @transform_7, window_bounds = array<i64: 16, 8>}]} {
    %c0 = arith.constant 0 : index
    %c0_0 = arith.constant 0 : index
    %0 = vector.load %arg1[%c0, %c0_0] : memref<16x16xbf16, #tpu.memory_space<vmem>>, vector<16x16xbf16>
    %c0_1 = arith.constant 0 : index
    %c0_2 = arith.constant 0 : index
    %1 = vector.load %arg2[%c0_1, %c0_2] : memref<16x128xbf16, #tpu.memory_space<vmem>>, vector<16x128xbf16>
    %cst = arith.constant dense<0.000000e+00> : vector<16x128xf32>
    %2 = tpu.matmul %0, %1, %cst {dimension_numbers = #tpu.dot_dimension_numbers<[1], [0], [0], [1], [0, 0, 1, 1], [], []>} : vector<16x16xbf16>, vector<16x128xbf16>, vector<16x128xf32> -> vector<16x128xf32>
    %c0_3 = arith.constant 0 : index
    %c0_4 = arith.constant 0 : index
    %3 = vector.load %arg3[%c0_3, %c0_4] : memref<1x128xf32, #tpu.memory_space<vmem>>, vector<1x128xf32>
    %4 = vector.broadcast %3 : vector<1x128xf32> to vector<16x128xf32>
    %5 = arith.addf %2, %4 : vector<16x128xf32>
    %cst_5 = arith.constant 0.000000e+00 : f32
    %6 = vector.broadcast %cst_5 : f32 to vector<16x128xf32>
    %7 = arith.subf %6, %5 : vector<16x128xf32>
    %8 = math.exp %7 : vector<16x128xf32>
    %cst_6 = arith.constant 1.000000e+00 : f32
    %9 = vector.broadcast %cst_6 : f32 to vector<16x128xf32>
    %10 = arith.addf %9, %8 : vector<16x128xf32>
    %11 = tpu.reciprocal %10 {approx = true} : vector<16x128xf32> -> vector<16x128xf32>
    %12 = arith.truncf %11 : vector<16x128xf32> to vector<16x128xbf16>
    %c0_7 = arith.constant 0 : index
    %c0_8 = arith.constant 0 : index
    %13 = vector.load %arg4[%c0_7, %c0_8] : memref<128x128xbf16, #tpu.memory_space<vmem>>, vector<128x128xbf16>
    %cst_9 = arith.constant dense<0.000000e+00> : vector<16x128xf32>
    %14 = tpu.matmul %12, %13, %cst_9 {dimension_numbers = #tpu.dot_dimension_numbers<[1], [0], [0], [1], [0, 0, 1, 1], [], []>} : vector<16x128xbf16>, vector<128x128xbf16>, vector<16x128xf32> -> vector<16x128xf32>
    %c0_10 = arith.constant 0 : index
    %c0_11 = arith.constant 0 : index
    %15 = vector.load %arg5[%c0_10, %c0_11] : memref<1x128xf32, #tpu.memory_space<vmem>>, vector<1x128xf32>
    %16 = vector.broadcast %15 : vector<1x128xf32> to vector<16x128xf32>
    %17 = arith.addf %14, %16 : vector<16x128xf32>
    %cst_12 = arith.constant 0.000000e+00 : f32
    %18 = vector.broadcast %cst_12 : f32 to vector<16x128xf32>
    %19 = arith.subf %18, %17 : vector<16x128xf32>
    %20 = math.exp %19 : vector<16x128xf32>
    %cst_13 = arith.constant 1.000000e+00 : f32
    %21 = vector.broadcast %cst_13 : f32 to vector<16x128xf32>
    %22 = arith.addf %21, %20 : vector<16x128xf32>
    %23 = tpu.reciprocal %22 {approx = true} : vector<16x128xf32> -> vector<16x128xf32>
    %24 = arith.truncf %23 : vector<16x128xf32> to vector<16x128xbf16>
    %c0_14 = arith.constant 0 : index
    %c0_15 = arith.constant 0 : index
    %25 = vector.load %arg6[%c0_14, %c0_15] : memref<128x8xbf16, #tpu.memory_space<vmem>>, vector<128x8xbf16>
    %cst_16 = arith.constant dense<0.000000e+00> : vector<16x8xf32>
    %26 = tpu.matmul %24, %25, %cst_16 {dimension_numbers = #tpu.dot_dimension_numbers<[1], [0], [0], [1], [0, 0, 1, 1], [], []>} : vector<16x128xbf16>, vector<128x8xbf16>, vector<16x8xf32> -> vector<16x8xf32>
    %c0_17 = arith.constant 0 : index
    %c0_18 = arith.constant 0 : index
    %27 = vector.load %arg7[%c0_17, %c0_18] : memref<1x8xf32, #tpu.memory_space<vmem>>, vector<1x8xf32>
    %28 = vector.broadcast %27 : vector<1x8xf32> to vector<16x8xf32>
    %29 = arith.addf %26, %28 : vector<16x8xf32>
    %cst_19 = arith.constant 0.000000e+00 : f32
    %30 = vector.broadcast %cst_19 : f32 to vector<16x8xf32>
    %31 = arith.subf %30, %29 : vector<16x8xf32>
    %32 = math.exp %31 : vector<16x8xf32>
    %cst_20 = arith.constant 1.000000e+00 : f32
    %33 = vector.broadcast %cst_20 : f32 to vector<16x8xf32>
    %34 = arith.addf %33, %32 : vector<16x8xf32>
    %cst_21 = arith.constant 1.000000e+00 : f32
    %35 = vector.broadcast %cst_21 : f32 to vector<16x8xf32>
    %36 = arith.divf %35, %34 : vector<16x8xf32>
    %c0_22 = arith.constant 0 : index
    %c0_23 = arith.constant 0 : index
    %37 = vector.load %arg8[%c0_22, %c0_23] : memref<16x8xf32, #tpu.memory_space<vmem>>, vector<16x8xf32>
    tpu.vector_store %arg8[%c0_22, %c0_23], %36 {strides = array<i32>} : memref<16x8xf32, #tpu.memory_space<vmem>>, vector<16x8xf32>,
    return
  }
  func.func @transform_0(%arg0: i32) -> (i32, i32) {
    %c0_i32 = arith.constant 0 : i32
    %c0_i32_0 = arith.constant 0 : i32
    return %arg0, %c0_i32 : i32, i32
  }
  func.func @transform_1(%arg0: i32) -> (i32, i32) {
    %c0_i32 = arith.constant 0 : i32
    %c0_i32_0 = arith.constant 0 : i32
    %c0_i32_1 = arith.constant 0 : i32
    return %c0_i32, %c0_i32_0 : i32, i32
  }
  func.func @transform_2(%arg0: i32) -> (i32, i32) {
    %c0_i32 = arith.constant 0 : i32
    %c0_i32_0 = arith.constant 0 : i32
    %c0_i32_1 = arith.constant 0 : i32
    return %c0_i32, %c0_i32_0 : i32, i32
  }
  func.func @transform_3(%arg0: i32) -> (i32, i32) {
    %c0_i32 = arith.constant 0 : i32
    %c0_i32_0 = arith.constant 0 : i32
    %c0_i32_1 = arith.constant 0 : i32
    return %c0_i32, %c0_i32_0 : i32, i32
  }
  func.func @transform_4(%arg0: i32) -> (i32, i32) {
    %c0_i32 = arith.constant 0 : i32
    %c0_i32_0 = arith.constant 0 : i32
    %c0_i32_1 = arith.constant 0 : i32
    return %c0_i32, %c0_i32_0 : i32, i32
  }
  func.func @transform_5(%arg0: i32) -> (i32, i32) {
    %c0_i32 = arith.constant 0 : i32
    %c0_i32_0 = arith.constant 0 : i32
    %c0_i32_1 = arith.constant 0 : i32
    return %c0_i32, %c0_i32_0 : i32, i32
  }
  func.func @transform_6(%arg0: i32) -> (i32, i32) {
    %c0_i32 = arith.constant 0 : i32
    %c0_i32_0 = arith.constant 0 : i32
    %c0_i32_1 = arith.constant 0 : i32
    return %c0_i32, %c0_i32_0 : i32, i32
  }
  func.func @transform_7(%arg0: i32) -> (i32, i32) {
    %c0_i32 = arith.constant 0 : i32
    %c0_i32_0 = arith.constant 0 : i32
    return %arg0, %c0_i32 : i32, i32
  }
}

</mosaic_0001>

<bundles_post_ra>
// kernel: tpu_custom_call.1
= control target key start
LH: loop header
LB: loop body
LE: loop exit
PB: predicated region body
PF: predicated region fallthrough
CT: control target
= control target key end

     0   :  { %12 = vsyncpa [#allocation3], 0  ;;  %s702_s0 = inlined_call_operand.vmem [shape: bf16[16,16], index: 0, kind: input, shape index: {}]   ;;  %s703_s1 = inlined_call_operand.hbm [shape: bf16[16,128], index: 1, kind: input, shape index: {}]   ;;  %s704_s2 = inlined_call_operand.vmem [shape: f32[1,128], index: 2, kind: input, shape index: {}]   ;;  %s705_s3 = inlined_call_operand.vmem [shape: bf16[128,128], index: 3, kind: input, shape index: {}]   ;;  %s706_s4 = inlined_call_operand.hbm [shape: f32[1,128], index: 4, kind: input, shape index: {}]   ;;  %s707_s5 = inlined_call_operand.vmem [shape: bf16[128,8], index: 5, kind: input, shape index: {}]   ;;  %s708_s6 = inlined_call_operand.vmem [shape: f32[1,8], index: 6, kind: input, shape index: {}]   ;;  %s709_s7 = inlined_call_operand.vmem [shape: f32[16,8], index: 7, kind: output, shape index: {}]  }
   0x1   :  { %13 = vsyncpa [#allocation5], 0  ;;  %s567_s24 = smov [#allocation2]  }
   0x2   :  { %s21_s25 = sshll.u32 %s567_s24, 4  ;;  %s22_s25 = int_to_ptr.vmem [resolvable:$true] %s21_s25 }
   0x3   :  { %s531_s26 = scalar_lea.vmem %s22_s25, 128  ;;  %p536_p1 = scmp.lt.s32.totalorder %s22_s25, %s22_s25 }
   0x4   :  { %p532_p0 = scmp.ne.s32.totalorder %s22_s25, %s531_s26  ;;  %p537_p2 = scmp.lt.s32.totalorder %s531_s26, %s531_s26 }
   0x6   :  { %p538_p3 = por %p537_p2, %p536_p1 }
   0x8   :  { %p539_p4 = pnand %p538_p3, %p532_p0 }
   0xa   :  { %542 = shalt.err (!%p539_p4)
}
   0xb   :  { %s568_s27 = smov 64   ;;  %s569_s28 = smov 4  }
   0xc   :  { %27 = dma.hbm_to_vmem [thread:$0]  %s703_s1, 128, %s22_s25, [#allocation3], %s568_s27, %s568_s27, %s569_s28  }
   0xd   :  { %s570_s8 = smov [#allocation4]  }
   0xe   :  { %s38_s9 = sshll.u32 %s570_s8, 4  ;;  %s39_s9 = int_to_ptr.vmem [resolvable:$true] %s38_s9 }
   0xf   :  { %s551_s10 = scalar_lea.vmem %s39_s9, 16  ;;  %s555_s11 = scalar_lea.vmem %s39_s9, 32 }
  0x10   :  { %p552_p5 = scmp.ne.s32.totalorder %s39_s9, %s551_s10  ;;  %p556_p6 = scmp.lt.s32.totalorder %s39_s9, %s39_s9 }
  0x11   :  { %p557_p7 = scmp.lt.s32.totalorder %s555_s11, %s551_s10 }
  0x13   :  { %p558_p8 = por %p557_p7, %p556_p6 }
  0x15   :  { %p559_p9 = pnand %p558_p8, %p552_p5 }
  0x17   :  { %562 = shalt.err (!%p559_p9)
}
  0x18   :  { %41 = dma.hbm_to_vmem [thread:$0]  %s706_s4, 16, %s39_s9, [#allocation5]  }
  0x19   :  { %563 = dma.done.wait [#allocation3], 128  }
  0x1a   :  { %564 = vsyncadd [#allocation3], 4294967168 }
  0x1b   :  { %565 = dma.done.wait [#allocation5], 16  }
  0x1c   :  { %566 = vsyncadd [#allocation5], 4294967280  ;;  %v571_v0 = vmov 0.0   ;;  %vm572_vm0 = vmmov 0   ;;  %v481_v1 = vld [vmem:[#allocation2] sm:$0xff]   ;;  %vm75_vm1 = vcmask 130048  }
  0x1d   :  { %429 = vmatprep.subr.bf16.mxu0 %v571_v0  ;;  %431 = vmatprep.mubr.msk.bf16.mxu0 %vm572_vm0, %v571_v0  ;;  %v482_v2 = vld [vmem:[%s702_s0] sm:$0xff]   ;;  %v483_v3 = vld [vmem:[%s705_s3 + $0x38] sm:$0xff]   ;;  %v484_v4 = vld [vmem:[%s705_s3 + $0x30] sm:$0xff]   ;;  %vm378_vm2 = vcmask 64512  }
  0x1e   :  { %435 = vmatprep.subr.bf16.mxu1 %v571_v0  ;;  %451 = vmatprep.mubr.msk.bf16.mxu1 %vm572_vm0, %v571_v0  ;;  %v485_v5 = vld [vmem:[%s705_s3 + $0x28] sm:$0xff]   ;;  %v486_v6 = vld [vmem:[%s705_s3 + $0x20] sm:$0xff]   ;;  %v487_v7 = vld [vmem:[%s705_s3 + $0x18] sm:$0xff]  }
  0x1f   :  { %430 = vmatpush3.bf16.msra.mxu0 %v481_v1  ;;  %436 = vmatpush3.bf16.msra.mxu1 %v483_v3  ;;  %v488_v8 = vld [vmem:[%s705_s3 + $0x10] sm:$0xff]   ;;  %v489_v9 = vld [vmem:[%s705_s3 + $0x8] sm:$0xff]   ;;  %v490_v10 = vld [vmem:[%s705_s3] sm:$0xff]  }
  0x20   :  { %455 = vmatprep.subr.bf16.mxu0 %v571_v0  ;;  %437 = vmatprep.subr.bf16.mxu1 %v571_v0  ;;  %v387_v11 = vld [vmem:[%s704_s2] ss:$0 sm:$0xff]  ;;  %v491_v29 = vld [vmem:[%s707_s5 + $0x38] sm:$0xff]   ;;  %v492_v30 = vld [vmem:[%s707_s5 + $0x30] sm:$0xff]  }
  0x21   :  { %v493_v31 = vld [vmem:[%s707_s5 + $0x28] sm:$0xff]   ;;  %v494_v32 = vld [vmem:[%s707_s5 + $0x20] sm:$0xff]   ;;  %v495_v33 = vld [vmem:[%s707_s5 + $0x18] sm:$0xff]  }
  0x22   :  { %432 = vmatmul.mubr.msk.bf16.vlgmr.msra.gmra.mxu0 %vm75_vm1, %v482_v2  ;;  %v496_v34 = vld [vmem:[%s707_s5 + $0x10] sm:$0xff]   ;;  %v497_v35 = vld [vmem:[%s707_s5 + $0x8] sm:$0xff]   ;;  %v498_v36 = vld [vmem:[%s707_s5] sm:$0xff]  }
  0x23   :  { %471 = vmatprep.mubr.msk.bf16.mxu0 %vm572_vm0, %v571_v0  ;;  %438 = vmatpush3.bf16.msra.mxu1 %v484_v4  ;;  %v391_v37 = vld [vmem:[#allocation4] ss:$0 sm:$0xff]  ;;  %v400_v55 = vld [vmem:[%s708_s6] ss:$0 sm:$0xff] }
  0x24   :  { %439 = vmatprep.subr.bf16.mxu1 %v571_v0  ;;  %456 = vmatpush3.bf16.msra.mxu0 %v491_v29 }
  0x25   :  { %457 = vmatprep.subr.bf16.mxu0 %v571_v0 }
  0x27   :  { %440 = vmatpush3.bf16.msra.mxu1 %v485_v5 }
  0x28   :  { %441 = vmatprep.subr.bf16.mxu1 %v571_v0  ;;  %458 = vmatpush3.bf16.msra.mxu0 %v492_v30 }
  0x29   :  { %459 = vmatprep.subr.bf16.mxu0 %v571_v0 }
  0x2b   :  { %442 = vmatpush3.bf16.msra.mxu1 %v486_v6 }
  0x2c   :  { %443 = vmatprep.subr.bf16.mxu1 %v571_v0  ;;  %460 = vmatpush3.bf16.msra.mxu0 %v493_v31 }
  0x2d   :  { %461 = vmatprep.subr.bf16.mxu0 %v571_v0 }
  0x2f   :  { %444 = vmatpush3.bf16.msra.mxu1 %v487_v7 }
  0x30   :  { %445 = vmatprep.subr.bf16.mxu1 %v571_v0  ;;  %462 = vmatpush3.bf16.msra.mxu0 %v494_v32 }
  0x31   :  { %463 = vmatprep.subr.bf16.mxu0 %v571_v0 }
  0x33   :  { %446 = vmatpush3.bf16.msra.mxu1 %v488_v8 }
  0x34   :  { %447 = vmatprep.subr.bf16.mxu1 %v571_v0  ;;  %464 = vmatpush3.bf16.msra.mxu0 %v495_v33 }
  0x35   :  { %465 = vmatprep.subr.bf16.mxu0 %v571_v0 }
  0x37   :  { %448 = vmatpush3.bf16.msra.mxu1 %v489_v9 }
  0x38   :  { %449 = vmatprep.subr.bf16.mxu1 %v571_v0  ;;  %466 = vmatpush3.bf16.msra.mxu0 %v496_v34 }
  0x39   :  { %467 = vmatprep.subr.bf16.mxu0 %v571_v0 }
  0x3b   :  { %450 = vmatpush3.bf16.msra.mxu1 %v490_v10 }
  0x3c   :  { %468 = vmatpush3.bf16.msra.mxu0 %v497_v35 }
  0x3d   :  { %469 = vmatprep.subr.bf16.mxu0 %v571_v0 }
  0x40   :  { %470 = vmatpush3.bf16.msra.mxu0 %v498_v36 }
  0xe2   :  { %v113_v12 = vpop.f32.mrf.mxu0 }
  0xe3   :  { %v114_v13 = vadd.f32 %v387_v11, %v113_v12 }
  0xe4   :  { %v433_v14 = vpop.f32.mrf.mxu0 }
  0xe5   :  { %v120_v15 = vsub.f32 0.0, %v114_v13 }
  0xe6   :  { %v116_v16 = vpop.f32.mrf.mxu0 }
  0xe7   :  { %v122_v17 = vmul.f32 1.442695, %v120_v15  ;;  %v117_v18 = vadd.f32 %v387_v11, %v116_v16 }
  0xe8   :  { %v434_v19 = vpop.f32.mrf.mxu0 }
  0xe9   :  { %499 = vpow2.f32 %v122_v17  ;;  %v121_v20 = vsub.f32 0.0, %v117_v18 }
  0xeb   :  { %v124_v21 = vmul.f32 1.442695, %v121_v20 }
  0xed   :  { %501 = vpow2.f32 %v124_v21 }
  0xf6   :  { %v500_v22 = vpop.eup %499 }
  0xf7   :  { %v126_v23 = vadd.f32 1.0, %v500_v22 }
  0xf9   :  { %503 = vrcp.f32 %v126_v23 }
  0xfa   :  { %v502_v24 = vpop.eup %501 }
  0xfb   :  { %v127_v25 = vadd.f32 1.0, %v502_v24 }
  0xfd   :  { %505 = vrcp.f32 %v127_v25 }
 0x106   :  { %v504_v26 = vpop.eup %503 }
 0x10a   :  { %v506_v27 = vpop.eup %505 }
 0x10b   :  { %v130_v28 = vpack.c.bf16 %v506_v27, %v504_v26 }
 0x10d   :  { %452 = vmatmul.mubr.bf16.vlgmr.msra.gmra.mxu1 %v130_v28 }
 0x1cd   :  { %v236_v38 = vpop.f32.mrf.mxu1 }
 0x1ce   :  { %v237_v39 = vadd.f32 %v391_v37, %v236_v38 }
 0x1cf   :  { %v453_v40 = vpop.f32.mrf.mxu1 }
 0x1d0   :  { %v243_v41 = vsub.f32 0.0, %v237_v39 }
 0x1d1   :  { %v239_v42 = vpop.f32.mrf.mxu1 }
 0x1d2   :  { %v245_v43 = vmul.f32 1.442695, %v243_v41  ;;  %v240_v44 = vadd.f32 %v391_v37, %v239_v42 }
 0x1d3   :  { %v454_v45 = vpop.f32.mrf.mxu1 }
 0x1d4   :  { %507 = vpow2.f32 %v245_v43  ;;  %v244_v46 = vsub.f32 0.0, %v240_v44 }
 0x1d6   :  { %v247_v47 = vmul.f32 1.442695, %v244_v46 }
 0x1d8   :  { %509 = vpow2.f32 %v247_v47 }
 0x1e1   :  { %v508_v48 = vpop.eup %507 }
 0x1e2   :  { %v249_v49 = vadd.f32 1.0, %v508_v48 }
 0x1e4   :  { %511 = vrcp.f32 %v249_v49 }
 0x1e5   :  { %v510_v50 = vpop.eup %509 }
 0x1e6   :  { %v250_v51 = vadd.f32 1.0, %v510_v50 }
 0x1e8   :  { %513 = vrcp.f32 %v250_v51 }
 0x1f1   :  { %v512_v52 = vpop.eup %511 }
 0x1f5   :  { %v514_v53 = vpop.eup %513 }
 0x1f6   :  { %v253_v54 = vpack.c.bf16 %v514_v53, %v512_v52 }
 0x1f8   :  { %472 = vmatmul.mubr.bf16.vlgmr.msra.gmra.mxu0 %v253_v54 }
 0x2b8   :  { %v359_v56 = vpop.f32.mrf.mxu0 }
 0x2b9   :  { %v360_v57 = vadd.f32 %v400_v55, %v359_v56 }
 0x2ba   :  { %v473_v58 = vpop.f32.mrf.mxu0 }
 0x2bb   :  { %v366_v59 = vsub.f32 0.0, %v360_v57 }
 0x2bc   :  { %v362_v60 = vpop.f32.mrf.mxu0 }
 0x2bd   :  { %v368_v61 = vmul.f32 1.442695, %v366_v59  ;;  %v363_v62 = vadd.f32 %v400_v55, %v362_v60 }
 0x2be   :  { %v474_v63 = vpop.f32.mrf.mxu0 }
 0x2bf   :  { %515 = vpow2.f32 %v368_v61  ;;  %v367_v0 = vsub.f32 0.0, %v363_v62 }
 0x2c1   :  { %v370_v1 = vmul.f32 1.442695, %v367_v0 }
 0x2c3   :  { %517 = vpow2.f32 %v370_v1 }
 0x2cc   :  { %v516_v2 = vpop.eup %515 }
 0x2cd   :  { %v372_v3 = vadd.f32 1.0, %v516_v2 }
 0x2cf   :  { %519 = vrcp.f32 %v372_v3 }
 0x2d0   :  { %v518_v4 = vpop.eup %517 }
 0x2d1   :  { %v373_v5 = vadd.f32 1.0, %v518_v4 }
 0x2d3   :  { %521 = vrcp.f32 %v373_v5 }
 0x2dc   :  { %v520_v6 = vpop.eup %519 }
 0x2dd   :  { %379 = vst.msk [vmem:[%s709_s7] sm:$0xff] %vm378_vm2, %v520_v6 }
 0x2e0   :  { %v522_v7 = vpop.eup %521 }
 0x2e1   :  { %380 = vst.msk [vmem:[%s709_s7 + $0x8] sm:$0xff] %vm378_vm2, %v522_v7 }
 0x2e2   :  { %385 = vsyncpa [#allocation3], 1 }
 0x2e3   :  { %386 = vsyncpa [#allocation5], 1 }

</bundles_post_ra>
